<compile_context>
chip_gen: v6e
topology: v6e:2x2x1
jax: 0.10.0
libtpu: 0.0.40
codegen_flags: <defaults>
</compile_context>

<pallas_src>
from functools import partial

import jax
import jax.numpy as jnp
import numpy as np
from jax.experimental import pallas as pl
from jax.experimental.pallas import tpu as pltpu

LANE = 128


def _round_up(v, m):
    return ((v + m - 1) // m) * m


def _causal_conv1d_kernel(x_ref, w_ref, b_ref, o_ref, work_ref, slab_ref, *,
                          kernel_size, stride, dilation, causal_padding, halo_pad):
    # x_ref:    (C_in, T_tile*stride)   current input time tile (batch squeezed)
    # w_ref:    (C_out, C_in*K)         packed weight, tap-major rows
    # b_ref:    (C_out, 128)            bias, lane-broadcast in wrapper (f32)
    # o_ref:    (C_out, T_tile)         output time tile
    # work_ref: (C_in, halo_pad + T_tile*stride)  persistent halo + staged tile
    # slab_ref: (C_in*K, T_tile)        im2col slab
    c_in, t_in_tile = x_ref.shape
    c_out, t_tile = o_ref.shape
    K = kernel_size

    # Zero the causal halo at the start of each batch row's time sweep: this IS
    # the causal left zero-padding (no HBM pad copy needed).
    if causal_padding > 0:
        @pl.when(pl.program_id(1) == 0)
        def _zero_halo():
            work_ref[:, :halo_pad] = jnp.zeros((c_in, halo_pad), dtype=work_ref.dtype)

    # Stage the current input tile after the halo (single lane-aligned copy).
    work_ref[:, halo_pad:] = x_ref[...]

    # im2col: K lane-shifted copies -> one big MXU contraction over C_in*K.
    base = halo_pad - causal_padding
    for k in range(K):
        start = base + k * dilation
        if stride == 1:
            slab_ref[k * c_in:(k + 1) * c_in, :] = work_ref[:, start:start + t_tile]
        else:
            # TODO(synk): stride>1 uses a strided lane slice (untested on HW);
            # fold the decimation into the DMA / polyphase layout if it gets hot.
            span = (t_tile - 1) * stride + 1
            xs = work_ref[:, start:start + span]
            slab_ref[k * c_in:(k + 1) * c_in, :] = xs[:, ::stride]

    # Carry the last `causal_padding` input columns into the halo for the next
    # time tile of this batch row (done after the slab reads above).
    if causal_padding > 0:
        work_ref[:, halo_pad - causal_padding:halo_pad] = (
            work_ref[:, halo_pad + t_in_tile - causal_padding:halo_pad + t_in_tile])

    # Single MXU contraction (C_out, C_in*K) @ (C_in*K, T_tile), f32 accumulate.
    acc = jnp.dot(w_ref[...], slab_ref[...], preferred_element_type=jnp.float32)
    bias = b_ref[...][:, :1]          # (C_out, 1) f32, lane-broadcasts over time
    o_ref[...] = (acc + bias).astype(o_ref.dtype)


def causal_conv1d(x, weight, bias, *, stride=1, dilation=1):
    """x: [B, C_in, T], weight: [C_out, C_in, K], bias: [C_out] -> [B, C_out, T_out].

    Matches CausalConv1d.forward (non-streaming path, padding_mode='zeros').
    """
    # TODO(synk): padding_mode other than 'zeros' (replicate/reflect) and Conv1d
    # kwargs like groups are not implemented; only the default zero-pad path is.
    B, C_in, T = x.shape
    C_out, c_in_w, K = weight.shape
    assert c_in_w == C_in

    causal_padding = max(0, dilation * (K - 1) - (stride - 1))
    receptive = dilation * (K - 1) + 1
    T_out = (T + causal_padding - receptive) // stride + 1
    assert T_out >= 1, "input shorter than the receptive field"

    halo_pad = _round_up(causal_padding, LANE) if causal_padding > 0 else 0

    # Time tile: lane-dense multiple of 128, sized against a conservative VMEM
    # budget (~6 MiB incl. double-buffered in/out + scratch) that fits default
    # scoped VMEM on v5e/v6e/v7x without raising vmem_limit_bytes.
    itemsize = x.dtype.itemsize
    T_tile = max(min(_round_up(T_out, LANE), 1024), LANE, halo_pad)

    def _vmem_bytes(tt):
        t_in = tt * stride
        return ((2 * C_in * t_in + 2 * C_out * tt) * itemsize        # in/out dbl-buffer
                + C_in * (halo_pad + t_in) * itemsize                # work scratch
                + C_in * K * tt * itemsize                           # im2col slab
                + 2 * (C_out * C_in * K * itemsize + C_out * LANE * 4))

    while T_tile - LANE >= max(LANE, halo_pad) and _vmem_bytes(T_tile) > 6 * 1024 * 1024:
        T_tile -= LANE

    T_in_tile = T_tile * stride
    n_t = (T_out + T_tile - 1) // T_tile

    # Pack weight for the fused contraction: rows ordered [tap k major, ci minor].
    w_packed = jnp.transpose(weight, (0, 2, 1)).reshape(C_out, K * C_in).astype(x.dtype)
    bias_b = jnp.broadcast_to(bias.astype(jnp.float32).reshape(C_out, 1), (C_out, LANE))

    kernel = partial(_causal_conv1d_kernel, kernel_size=K, stride=stride,
                     dilation=dilation, causal_padding=causal_padding,
                     halo_pad=halo_pad)

    return pl.pallas_call(
        kernel,
        out_shape=jax.ShapeDtypeStruct((B, C_out, T_out), x.dtype),
        grid_spec=pltpu.PrefetchScalarGridSpec(
            num_scalar_prefetch=0,
            grid=(B, n_t),                                    # time innermost (halo carry)
            in_specs=[
                pl.BlockSpec((None, C_in, T_in_tile), lambda b, t: (b, 0, t)),
                pl.BlockSpec((C_out, K * C_in), lambda b, t: (0, 0)),   # shared weight
                pl.BlockSpec((C_out, LANE), lambda b, t: (0, 0)),       # shared bias
            ],
            out_specs=pl.BlockSpec((None, C_out, T_tile), lambda b, t: (b, 0, t)),
            scratch_shapes=[
                pltpu.VMEM((C_in, halo_pad + T_in_tile), x.dtype),      # halo + staged tile
                pltpu.VMEM((K * C_in, T_tile), x.dtype),                # im2col slab
            ],
        ),
        compiler_params=pltpu.CompilerParams(
            dimension_semantics=("parallel", "arbitrary"),
        ),
    )(x, w_packed, bias_b)


def _reference(x, weight, bias, *, stride=1, dilation=1):
    K = weight.shape[-1]
    causal_padding = max(0, dilation * (K - 1) - (stride - 1))
    x_pad = jnp.pad(x, ((0, 0), (0, 0), (causal_padding, 0)))
    out = jax.lax.conv_general_dilated(
        x_pad, weight, window_strides=(stride,), padding="VALID",
        rhs_dilation=(dilation,),
        dimension_numbers=("NCH", "OIH", "NCH"))
    return out + bias[None, :, None]


if __name__ == "__main__":
    B, C_in, C_out, K, T = 2, 4, 8, 4, 64

    key = jax.random.PRNGKey(0)
    kx, kw, kb = jax.random.split(key, 3)
    x = jax.random.normal(kx, (B, C_in, T), dtype=jnp.float32)
    weight = jax.random.normal(kw, (C_out, C_in, K), dtype=jnp.float32) * 0.1
    bias = jax.random.normal(kb, (C_out,), dtype=jnp.float32) * 0.1

    # dilation = 1
    out = jax.block_until_ready(causal_conv1d(x, weight, bias, stride=1, dilation=1))
    ref = jax.block_until_ready(_reference(x, weight, bias, stride=1, dilation=1))
    np.testing.assert_allclose(np.asarray(out), np.asarray(ref), rtol=1e-5, atol=1e-5)

    # dilated causal conv (halo wider than one tap spacing)
    out2 = jax.block_until_ready(causal_conv1d(x, weight, bias, stride=1, dilation=2))
    ref2 = jax.block_until_ready(_reference(x, weight, bias, stride=1, dilation=2))
    np.testing.assert_allclose(np.asarray(out2), np.asarray(ref2), rtol=1e-5, atol=1e-5)

    print("KERNEL_OK")
</pallas_src>

<mosaic_0001>
module attributes {stable_mosaic.version = 11 : i64} {
  func.func @_causal_conv1d_kernel(%arg0: i32, %arg1: i32, %arg2: memref<1x4x128xf32, #tpu.memory_space<vmem>>, %arg3: memref<8x16xf32, #tpu.memory_space<vmem>>, %arg4: memref<8x128xf32, #tpu.memory_space<vmem>>, %arg5: memref<1x8x128xf32, #tpu.memory_space<vmem>>, %arg6: memref<4x256xf32, #tpu.memory_space<vmem>>, %arg7: memref<16x128xf32, #tpu.memory_space<vmem>>) attributes {dimension_semantics = [#tpu.dimension_semantics<parallel>, #tpu.dimension_semantics<arbitrary>], iteration_bounds = array<i64: 2, 1>, scalar_prefetch = 0 : i64, scratch_operands = 2 : i64, tpu.core_type = #tpu.core_type<tc>, window_params = [{transform_indices = @transform_0, window_bounds = array<i64: 1, 4, 128>}, {pipeline_mode = #tpu.pipeline_mode<synchronous>, transform_indices = @transform_1, window_bounds = array<i64: 8, 16>}, {pipeline_mode = #tpu.pipeline_mode<synchronous>, transform_indices = @transform_2, window_bounds = array<i64: 8, 128>}, {transform_indices = @transform_3, window_bounds = array<i64: 1, 8, 128>}]} {
    %c0_i32 = arith.constant 0 : i32
    %0 = arith.cmpi eq, %arg1, %c0_i32 : i32
    %1 = arith.extui %0 : i1 to i32
    %c0_i32_0 = arith.constant 0 : i32
    %2 = arith.cmpi ne, %1, %c0_i32_0 : i32
    scf.if %2 {
      %cst_26 = arith.constant 0.000000e+00 : f32
      %26 = vector.broadcast %cst_26 : f32 to vector<4x128xf32>
      %c0_27 = arith.constant 0 : index
      %c0_28 = arith.constant 0 : index
      %27 = vector.load %arg6[%c0_27, %c0_28] : memref<4x256xf32, #tpu.memory_space<vmem>>, vector<4x128xf32>
      tpu.vector_store %arg6[%c0_27, %c0_28], %26 {strides = array<i32>} : memref<4x256xf32, #tpu.memory_space<vmem>>, vector<4x128xf32>,
    } else {
    }
    %c0 = arith.constant 0 : index
    %c0_1 = arith.constant 0 : index
    %c0_2 = arith.constant 0 : index
    %3 = vector.load %arg2[%c0, %c0_1, %c0_2] : memref<1x4x128xf32, #tpu.memory_space<vmem>>, vector<1x4x128xf32>
    %4 = vector.shape_cast %3 : vector<1x4x128xf32> to vector<4x128xf32>
    %c0_3 = arith.constant 0 : index
    %c128 = arith.constant 128 : index
    %5 = vector.load %arg6[%c0_3, %c128] : memref<4x256xf32, #tpu.memory_space<vmem>>, vector<4x128xf32>
    tpu.vector_store %arg6[%c0_3, %c128], %4 {strides = array<i32>} : memref<4x256xf32, #tpu.memory_space<vmem>>, vector<4x128xf32>,
    %c0_4 = arith.constant 0 : index
    %c125 = arith.constant 125 : index
    %6 = vector.load %arg6[%c0_4, %c125] : memref<4x256xf32, #tpu.memory_space<vmem>>, vector<4x128xf32>
    %c0_5 = arith.constant 0 : index
    %c0_6 = arith.constant 0 : index
    %7 = vector.load %arg7[%c0_5, %c0_6] : memref<16x128xf32, #tpu.memory_space<vmem>>, vector<4x128xf32>
    tpu.vector_store %arg7[%c0_5, %c0_6], %6 {strides = array<i32>} : memref<16x128xf32, #tpu.memory_space<vmem>>, vector<4x128xf32>,
    %c0_7 = arith.constant 0 : index
    %c126 = arith.constant 126 : index
    %8 = vector.load %arg6[%c0_7, %c126] : memref<4x256xf32, #tpu.memory_space<vmem>>, vector<4x128xf32>
    %c4 = arith.constant 4 : index
    %c0_8 = arith.constant 0 : index
    %9 = vector.load %arg7[%c4, %c0_8] : memref<16x128xf32, #tpu.memory_space<vmem>>, vector<4x128xf32>
    tpu.vector_store %arg7[%c4, %c0_8], %8 {strides = array<i32>} : memref<16x128xf32, #tpu.memory_space<vmem>>, vector<4x128xf32>,
    %c0_9 = arith.constant 0 : index
    %c127 = arith.constant 127 : index
    %10 = vector.load %arg6[%c0_9, %c127] : memref<4x256xf32, #tpu.memory_space<vmem>>, vector<4x128xf32>
    %c8 = arith.constant 8 : index
    %c0_10 = arith.constant 0 : index
    %11 = vector.load %arg7[%c8, %c0_10] : memref<16x128xf32, #tpu.memory_space<vmem>>, vector<4x128xf32>
    tpu.vector_store %arg7[%c8, %c0_10], %10 {strides = array<i32>} : memref<16x128xf32, #tpu.memory_space<vmem>>, vector<4x128xf32>,
    %c0_11 = arith.constant 0 : index
    %c128_12 = arith.constant 128 : index
    %12 = vector.load %arg6[%c0_11, %c128_12] : memref<4x256xf32, #tpu.memory_space<vmem>>, vector<4x128xf32>
    %c12 = arith.constant 12 : index
    %c0_13 = arith.constant 0 : index
    %13 = vector.load %arg7[%c12, %c0_13] : memref<16x128xf32, #tpu.memory_space<vmem>>, vector<4x128xf32>
    tpu.vector_store %arg7[%c12, %c0_13], %12 {strides = array<i32>} : memref<16x128xf32, #tpu.memory_space<vmem>>, vector<4x128xf32>,
    %c0_14 = arith.constant 0 : index
    %c253 = arith.constant 253 : index
    %14 = vector.load %arg6[%c0_14, %c253] : memref<4x256xf32, #tpu.memory_space<vmem>>, vector<4x3xf32>
    %c0_15 = arith.constant 0 : index
    %c125_16 = arith.constant 125 : index
    %15 = vector.load %arg6[%c0_15, %c125_16] : memref<4x256xf32, #tpu.memory_space<vmem>>, vector<4x3xf32>
    tpu.vector_store %arg6[%c0_15, %c125_16], %14 {strides = array<i32>} : memref<4x256xf32, #tpu.memory_space<vmem>>, vector<4x3xf32>,
    %c0_17 = arith.constant 0 : index
    %c0_18 = arith.constant 0 : index
    %16 = vector.load %arg3[%c0_17, %c0_18] : memref<8x16xf32, #tpu.memory_space<vmem>>, vector<8x16xf32>
    %c0_19 = arith.constant 0 : index
    %c0_20 = arith.constant 0 : index
    %17 = vector.load %arg7[%c0_19, %c0_20] : memref<16x128xf32, #tpu.memory_space<vmem>>, vector<16x128xf32>
    %cst = arith.constant dense<0.000000e+00> : vector<8x128xf32>
    %18 = tpu.matmul %16, %17, %cst {dimension_numbers = #tpu.dot_dimension_numbers<[1], [0], [0], [1], [0, 0, 1, 1], [], []>} : vector<8x16xf32>, vector<16x128xf32>, vector<8x128xf32> -> vector<8x128xf32>
    %c0_21 = arith.constant 0 : index
    %c0_22 = arith.constant 0 : index
    %19 = vector.load %arg4[%c0_21, %c0_22] : memref<8x128xf32, #tpu.memory_space<vmem>>, vector<8x128xf32>
    %20 = vector.extract_strided_slice %19 {offsets = [0, 0], sizes = [8, 1], strides = [1, 1]} : vector<8x128xf32> to vector<8x1xf32>
    %21 = vector.broadcast %20 : vector<8x1xf32> to vector<8x128xf32>
    %22 = arith.addf %18, %21 : vector<8x128xf32>
    %c0_23 = arith.constant 0 : index
    %c0_24 = arith.constant 0 : index
    %c0_25 = arith.constant 0 : index
    %23 = vector.load %arg5[%c0_23, %c0_24, %c0_25] : memref<1x8x128xf32, #tpu.memory_space<vmem>>, vector<1x8x128xf32>
    %24 = vector.shape_cast %23 : vector<1x8x128xf32> to vector<8x128xf32>
    %25 = vector.shape_cast %22 : vector<8x128xf32> to vector<1x8x128xf32>
    tpu.vector_store %arg5[%c0_23, %c0_24, %c0_25], %25 {strides = array<i32>} : memref<1x8x128xf32, #tpu.memory_space<vmem>>, vector<1x8x128xf32>,
    return
  }
  func.func @transform_0(%arg0: i32, %arg1: i32) -> (i32, i32, i32) {
    %c0_i32 = arith.constant 0 : i32
    %c0_i32_0 = arith.constant 0 : i32
    return %arg0, %c0_i32, %arg1 : i32, i32, i32
  }
  func.func @transform_1(%arg0: i32, %arg1: i32) -> (i32, i32) {
    %c0_i32 = arith.constant 0 : i32
    %c0_i32_0 = arith.constant 0 : i32
    %c0_i32_1 = arith.constant 0 : i32
    return %c0_i32, %c0_i32_0 : i32, i32
  }
  func.func @transform_2(%arg0: i32, %arg1: i32) -> (i32, i32) {
    %c0_i32 = arith.constant 0 : i32
    %c0_i32_0 = arith.constant 0 : i32
    %c0_i32_1 = arith.constant 0 : i32
    return %c0_i32, %c0_i32_0 : i32, i32
  }
  func.func @transform_3(%arg0: i32, %arg1: i32) -> (i32, i32, i32) {
    %c0_i32 = arith.constant 0 : i32
    %c0_i32_0 = arith.constant 0 : i32
    return %arg0, %c0_i32, %arg1 : i32, i32, i32
  }
}

</mosaic_0001>

<bundles_post_ra>
// kernel: tpu_custom_call.1
= control target key start
LH: loop header
LB: loop body
LE: loop exit
PB: predicated region body
PF: predicated region fallthrough
CT: control target
= control target key end

     0   :  { %8 = vsyncpa [#allocation5], 0  ;;  %s967_s0 = inlined_call_operand.hbm [shape: f32[2,4,64], index: 0, kind: input, shape index: {}]   ;;  %s968_s1 = inlined_call_operand.hbm [shape: f32[8,16], index: 1, kind: input, shape index: {}]   ;;  %s969_s2 = inlined_call_operand.hbm [shape: f32[8,128], index: 2, kind: input, shape index: {}]   ;;  %s970_s3 = inlined_call_operand.hbm [shape: f32[2,8,64], index: 3, kind: output, shape index: {}]  }
   0x1   :  { %10 = vsyncpa [#allocation5 + $0x1], 0 }
   0x2   :  { %11 = vsyncpa [#allocation8], 0 }
   0x3   :  { %12 = vsyncpa [#allocation6], 0 }
   0x4   :  { %14 = vsyncpa [#allocation6 + $0x1], 0  ;;  %s786_s12 = smov 0   ;;  %s788_s13 = smov 0  }
   0x5   :  { %s790_s14 = smov 0   ;;  %s792_s15 = smov 0  }
   0x6   :  { %s794_s16 = smov 0   ;;  %s796_s17 = smov 0  }
   0x7 LB: > { %s471_s18 = sadd.s32 4294967295, %s754_s17   ;;  %s472_s19 = sadd.s32 4294967294, %s754_s17   ;;  %s754_s17 = sphi %s796_s17, %s20_s17   ;;  %s750_s16 = sphi %s794_s16, %s993_s16   ;;  %s746_s15 = sphi %s792_s15, %s992_s15   ;;  %s742_s14 = sphi %s790_s14, %s991_s14   ;;  %s738_s13 = sphi %s788_s13, %s990_s13   ;;  %s734_s12 = sphi %s786_s12, %s989_s12  }
   0x8   : > { %p54_p0 = scmp.ne.s32.totalorder %s738_s13, %s734_s12  ;;  %p820_p1 = scmp.eq.s32.totalorder %s471_s18, 0 }
   0x9   : > { %p824_p2 = scmp.eq.s32.totalorder %s471_s18, 1  ;;  %p128_p3 = scmp.eq.s32.totalorder %s472_s19, 1 }
   0xa   : > { %s975_s20 = scalar_select %p820_p1, 1, 0 }
   0xb   : > { %s976_s21 = scalar_select %p824_p2, 1, 0 }
   0xc   : > { %p830_p4 = por %p820_p1, %p54_p0  ;;  %p473_p5 = scmp.ge.s32.totalorder %s754_s17, 1 }
   0xd   : > { %p835_p6 = por %p128_p3, %p54_p0  ;;  %p135_p7 = scmp.lt.s32.totalorder %s754_s17, 3 }
   0xe   : > { %s977_s22 = scalar_select %p830_p4, 1, 0 }
   0xf   : > { %s978_s23 = scalar_select %p835_p6, 1, 0 }
  0x10   : > { %p840_p8 = pnand %p473_p5, %p135_p7  ;;  %s756_s25 = smov [#allocation7]  }
  0x11   : > { %s148_s26 = sshll.u32 %s756_s25, 4  ;;  %s757_s27 = smov [#allocation9]   ;;  %s149_s26 = int_to_ptr.vmem [resolvable:$true] %s148_s26 }
  0x12   : > { %s979_s24 = scalar_select %p840_p8, 1, 0 }
  0x13   : > { %p511_p10 = pneg %p840_p8  ;;  %s159_s28 = sshll.u32 %s757_s27, 4  ;;  %s160_s28 = int_to_ptr.vmem [resolvable:$true] %s159_s28 }
  0x14   : > { %s601_s30 = scalar_lea.vmem %s149_s26, 128  ;;  %p609_p5 = scmp.lt.s32.totalorder %s149_s26, %s149_s26 }
  0x15   : > { %p849_p11 = pnand %p511_p10, %p820_p1  ;;  %p602_p13 = scmp.ne.s32.totalorder %s149_s26, %s601_s30 }
  0x16   : > { %p610_p7 = scmp.lt.s32.totalorder %s601_s30, %s601_s30 }
  0x17   : > { %p592_p12 = pneg %p849_p11 }
  0x18   : > { %p611_p9 = por %p610_p7, %p609_p5 }
  0x19   : > { %p604_p0 = pnand %p602_p13, %p592_p12 }
  0x1b   : > { %p605_p3 = pneg %p604_p0 }
  0x1d   : > { %p612_p6 = pnand %p611_p9, %p605_p3 }
  0x1f   : > { %615 = shalt.err (!%p612_p6)
}
  0x20   : > { %514 = dma.hbm_to_vmem [thread:$0]  (!%p849_p11), %s968_s1, 128, %s149_s26, [#allocation8]  }
  0x21   : > { %s627_s6 = scalar_lea.vmem %s160_s28, 128  ;;  %p635_p13 = scmp.lt.s32.totalorder %s160_s28, %s160_s28 }
  0x22   : > { %p628_p10 = scmp.ne.s32.totalorder %s160_s28, %s627_s6  ;;  %p636_p0 = scmp.lt.s32.totalorder %s627_s6, %s627_s6 }
  0x24   : > { %p630_p1 = pnand %p628_p10, %p592_p12  ;;  %p637_p8 = por %p636_p0, %p635_p13 }
  0x26   : > { %p631_p4 = pneg %p630_p1 }
  0x28   : > { %p638_p2 = pnand %p637_p8, %p631_p4 }
  0x2a   : > { %641 = shalt.err (!%p638_p2)
}
  0x2b   : > { %517 = dma.hbm_to_vmem [thread:$0]  (!%p849_p11), %s969_s2, 128, %s160_s28, [#allocation8]  }
  0x2c   : > { %s32_s9 = sadd.s32 1, %s750_s16  ;;  %s41_s10 = sadd.s32 1, %s742_s14 }
  0x2d   : > { %p34_p1 = scmp.ge.s32.totalorder %s32_s9, 2  ;;  %p48_p2 = scmp.ne.s32.totalorder %s742_s14, %s738_s13 }
  0x2e   : > { %p49_p4 = scmp.eq.s32.totalorder %s754_s17, 0  ;;  %p528_p6 = scmp.lt.s32.totalorder %s754_s17, 2 }
  0x2f   : > { %s995_s9 = smov (%p34_p1, %s32_s9), 0  ;;  %p981_p9 = scmp.ne.s32.totalorder %s976_s21, 0 }
  0x30   : > { %p50_p8 = por %p49_p4, %p48_p2  ;;  %s36_s18 = ssub.s32 %s750_s16, %s995_s9 }
  0x31   : > { %p881_p12 = por %p981_p9, %p48_p2  ;;  %s170_s19 = sand.u32 1, %s742_s14  }
  0x32   : > { %p39_p3 = scmp.eq.s32.totalorder %s36_s18, 0  ;;  %s477_s25 = sshll.u32 %s170_s19, 2 }
  0x33   : > { %s478_s26 = sshll.u32 %s750_s16, 6  ;;  %s174_s4 = scalar_lea.vmem [#allocation4], %s477_s25 }
  0x34   : > { %s890_s27 = scalar_select %p39_p3, %s742_s14, %s41_s10  }
  0x35   : > { %s180_s30 = scalar_lea.hbm %s967_s0, %s478_s26  ;;  %s182_s5 = sshll.u32 %s174_s4, 4  ;;  %s183_s5 = int_to_ptr.vmem [resolvable:$true] %s182_s5 }
  0x36   : > { %p897_p11 = pnand %p528_p6, %p50_p8  ;;  %s171_s6 = scalar_lea.sflag [#allocation5], %s170_s19 }
  0x37   : > { %s655_s7 = scalar_lea.vmem %s183_s5, 64  ;;  %s758_s8 = smov [#allocation4]  }
  0x38   : > { %p644_p5 = pneg %p897_p11  ;;  %p656_p7 = scmp.ne.s32.totalorder %s183_s5, %s655_s7 }
  0x39   : > { %s660_s10 = sshll.u32 %s758_s8, 4  ;;  %s661_s10 = int_to_ptr.vmem [resolvable:$false] %s660_s10 }
  0x3a   : > { %p658_p10 = pnand %p656_p7, %p644_p5  ;;  %s662_s18 = scalar_lea.vmem %s661_s10, 128 }
  0x3b   : > { %p663_p0 = scmp.lt.s32.totalorder %s183_s5, %s661_s10  ;;  %p664_p1 = scmp.lt.s32.totalorder %s662_s18, %s655_s7 }
  0x3c   : > { %p659_p13 = pneg %p658_p10 }
  0x3d   : > { %p665_p2 = por %p664_p1, %p663_p0 }
  0x3f   : > { %p666_p4 = pnand %p665_p2, %p659_p13 }
  0x41   : > { %669 = shalt.err (!%p666_p4)
}
  0x42   : > { %521 = dma.hbm_to_vmem [thread:$0]  (!%p897_p11), %s180_s30, 64, %s183_s5, %s171_s6  }
  0x43   : > { %p984_p6 = scmp.ne.s32.totalorder %s979_s24, 0 }
  0x44   : > { %s908_s19 = sand.u32 (!%p984_p6), 1, %s738_s13   ;;  %p985_p8 = scmp.ne.s32.totalorder (!%p984_p6), %s977_s22, 0 }
  0x45   : > { %191 = sbr.rel (%p984_p6) target bundleno = 428 (0x1ac), region = 32  ;;  %s480_s25 = sshll.u32 (!%p984_p6), %s908_s19, 2 }
  0x46   : > { %s194_s26 = scalar_lea.sflag (!%p984_p6), [#allocation5], %s908_s19  ;;  %s197_s28 = scalar_lea.vmem (!%p984_p6), [#allocation4], %s480_s25 }
  0x4a   : > { %721 = dma.done.wait (%p985_p8), %s194_s26, 64  }
  0x4b   : > { %723 = vsyncadd (%p985_p8), %s194_s26, 4294967232  ;;  %p986_p9 = scmp.ne.s32.totalorder %s975_s20, 0 }
  0x4d   : > { %725 = dma.done.wait (%p986_p9), [#allocation8], 256  }
  0x4e   : > { %727 = vsyncadd (%p986_p9), [#allocation8], 4294967040  ;;  %v759_v0 = vmov 0.0   ;;  %v233_v1 = vld [vmem:[%s197_s28] sm:$0xf]  ;;  %vm271_vm0 = vcmask 1044456  }
  0x4f   : > { %232 = vst [vmem:[#allocation2] sm:$0xf] %v759_v0  ;;  %492 = vmatprep.subr.mxu0 %v759_v0  ;;  %234 = vst [vmem:[#allocation2 + $0x4] sm:$0xf] %v233_v1  ;;  %s760_s24 = smov 1   ;;  %s761_s29 = smov 3  }
  0x50   : > { %vm762_vm1 = vmmov 0   ;;  %v763_v6 = vmov 0   ;;  %s764_s20 = smov 2   ;;  %v276_v7 = vld [vmem:[#allocation9] sm:$0xff]  ;;  %vm264_vm2 = vcmask 7168   ;;  %vm242_vm3 = vcmask 23552  }
  0x51   : > { %496 = vmatprep.mubr.msk.f32.mxu0 %vm762_vm1, %v759_v0  ;;  %588 = vset.pattern.permute.xlu0 %v763_v6  ;;  %vm253_vm4 = vcmask 15360   ;;  %v273_v18 = vld [vmem:[#allocation7] sm:$0xff]  ;;  %vm282_vm5 = vcmask 130048   ;;  %s483_s22 = sshll.u32 %s908_s19, 3  ;;  %s486_s30 = sshll.u32 %s746_s15, 7 }
  0x52   : > { %s227_s4 = scalar_lea.vmem [#allocation10], %s483_s22  ;;  %s925_s7 = scalar_lea.hbm %s970_s3, %s486_s30 }
  0x53   : > { %s372_s5 = sshll.u32 %s227_s4, 4  ;;  %s358_s8 = scalar_lea.sflag [#allocation6], %s908_s19  ;;  %s373_s5 = int_to_ptr.vmem [resolvable:$true] %s372_s5 }
  0x54   : > { %s670_s10 = scalar_lea.vmem %s373_s5, 128  ;;  %s765_s18 = smov [#allocation10]  }
  0x55   : > { %p671_p3 = scmp.ne.s32.totalorder %s373_s5, %s670_s10  ;;  %s674_s15 = sshll.u32 %s765_s18, 4  ;;  %s675_s15 = int_to_ptr.vmem [resolvable:$false] %s674_s15 }
  0x56   : > { %v257_v2 = vld [vmem:[#allocation2] sm:$0xff]  ;;  %s676_s25 = scalar_lea.vmem %s675_s15, 256  ;;  %p677_p7 = scmp.lt.s32.totalorder %s373_s5, %s675_s15 }
  0x57   : > { %v270_v3 = vld [vmem:[#allocation2 + $0x4] sm:$0xf]  ;;  %260 = vrot.lane.b32.xlu0 %v257_v2, %s760_s24  ;;  %238 = vrot.lane.b32.xlu1 %v257_v2, %s761_s29  ;;  %v259_v5 = vcombine.high %v257_v2, %v257_v2  ;;  %p672_p11 = pnand %p671_p3, %p881_p12  ;;  %p678_p10 = scmp.lt.s32.totalorder %s676_s25, %s670_s10 }
  0x58   : > { %v268_v4 = vld [vmem:[#allocation2 + $0x4] sm:$0xf]  ;;  %272 = vst.msk [vmem:[#allocation2] sm:$0xf] %vm271_vm0, %v270_v3 }
  0x59   : > { %269 = vst [vmem:[#allocation3 + $0xc] sm:$0xf] %v268_v4  ;;  %p673_p5 = pneg %p672_p11  ;;  %p679_p13 = por %p678_p10, %p677_p7 }
  0x5b   : > { %262 = vrot.lane.b32.xlu0 %v259_v5, %s760_s24  ;;  %240 = vrot.lane.b32.xlu1 %v259_v5, %s761_s29  ;;  %p680_p0 = pnand %p679_p13, %p673_p5 }
  0x5f   : > { %249 = vrot.lane.b32.xlu0 %v257_v2, %s764_s20  ;;  %251 = vrot.lane.b32.xlu1 %v259_v5, %s764_s20 }
  0x63   : > { %279 = vperm.xlu0 %588, %v276_v7  }
  0xc9   : > { %v261_v8 = vpop.permute.xlu0 %260  ;;  %v239_v9 = vpop.permute.xlu1 %238 }
  0xcd   : > { %v263_v10 = vpop.permute.xlu0 %262  ;;  %v241_v11 = vpop.permute.xlu1 %240 }
  0xce   : > { %v265_v12 = vsel %vm264_vm2, %v261_v8, %v263_v10  ;;  %v243_v13 = vsel %vm242_vm3, %v239_v9, %v241_v11 }
  0xcf   : > { %267 = vst [vmem:[#allocation3 + $0x8] sm:$0xf] %v265_v12  ;;  %245 = vst [vmem:[#allocation3] sm:$0xf] %v243_v13 }
  0xd1   : > { %v250_v14 = vpop.permute.xlu0 %249  ;;  %v252_v15 = vpop.permute.xlu1 %251 }
  0xd2   : > { %v254_v16 = vsel %vm253_vm4, %v250_v14, %v252_v15 }
  0xd3   : > { %256 = vst [vmem:[#allocation3 + $0x4] sm:$0xf] %v254_v16 }
  0xd6   : > { %v275_v17 = vld [vmem:[#allocation3 + $0x8] sm:$0xff] }
  0xd7   : > { %493 = vmatpush3.msra.mxu0 %v275_v17 }
  0xd8   : > { %494 = vmatprep.subr.mxu0 %v759_v0 }
  0xda   : > { %v274_v19 = vld [vmem:[#allocation3] sm:$0xff] }
  0xdb   : > { %495 = vmatpush3.msra.mxu0 %v274_v19 }
  0xdc   : > { %497 = vmatmul.mubr.msk.f32.vlgmr.msra.gmra.mxu0 %vm282_vm5, %v273_v18 }
  0xde   : > { %v280_v20 = vpop.permute.xlu0 %279 }
 0x19c   : > { %v352_v21 = vpop.f32.mrf.mxu0 }
 0x19d   : > { %v353_v22 = vadd.f32 %v352_v21, %v280_v20 }
 0x19e   : > { %v498_v23 = vpop.f32.mrf.mxu0 }
 0x19f   : > { %356 = vst [vmem:[%s227_s4] sm:$0xff] %v353_v22 }
 0x1a0   : > { %683 = shalt.err (!%p680_p0)
}
 0x1a1   : > { %s684_s26 = scalar_lea.hbm %s925_s7, 128  ;;  %s688_s24 = scalar_lea.hbm %s970_s3, 256 }
 0x1a2   : > { %p685_p1 = scmp.ne.s32.totalorder %s925_s7, %s684_s26  ;;  %p689_p6 = scmp.lt.s32.totalorder %s925_s7, %s970_s3 }
 0x1a3   : > { %p690_p8 = scmp.lt.s32.totalorder %s688_s24, %s684_s26 }
 0x1a4   : > { %p686_p2 = pnand %p685_p1, %p881_p12 }
 0x1a5   : > { %p691_p9 = por %p690_p8, %p689_p6 }
 0x1a6   : > { %p687_p4 = pneg %p686_p2 }
 0x1a8   : > { %p692_p3 = pnand %p691_p9, %p687_p4 }
 0x1aa   : > { %695 = shalt.err (!%p692_p3)
}
 0x1ab   : > { %509 = dma.vmem_to_hbm [thread:$0]  (%p881_p12), %s373_s5, 128, %s925_s7, %s358_s8  }
 0x1ac PF: > { %s384_s22 = sand.u32 1, %s734_s12   ;;  %p987_p11 = scmp.ne.s32.totalorder %s978_s23, 0 }
 0x1ad   : > { %p988_p5 = scmp.ge.s32.totalorder %s754_s17, 2  ;;  %s385_s30 = scalar_lea.sflag [#allocation6], %s384_s22 }
 0x1af   : > { %p523_p7 = pnand %p988_p5, %p987_p11 }
 0x1b1   : > { %p524_p10 = pneg %p523_p7 }
 0x1b3   : > { %729 = dma.done.wait (%p524_p10), %s385_s30, 128  }
 0x1b4   : > { %731 = vsyncadd (%p524_p10), %s385_s30, 4294967168  ;;  %s20_s17 = sadd.s32 1, %s754_s17   ;;  %s989_s12 = smov %s738_s13 }
 0x1b5   : > { %p17_p13 = scmp.ge.s32.totalorder %s20_s17, 4   ;;  %s990_s13 = smov %s742_s14 }
 0x1b6   : > { %s991_s14 = smov %s890_s27  ;;  %s992_s15 = smov %s750_s16 }
 0x1b7   : > { %s993_s16 = smov %s995_s9  ;;  %19 = sbr.rel (!%p17_p13) target bundleno = 7 (0x7), region = 89 }
 0x1bc   :  { %390 = vsyncpa [#allocation5], 1 }
 0x1bd   :  { %392 = vsyncpa [#allocation5 + $0x1], 1 }
 0x1be   :  { %393 = vsyncpa [#allocation8], 1 }
 0x1bf   :  { %394 = vsyncpa [#allocation6], 1 }
 0x1c0   :  { %396 = vsyncpa [#allocation6 + $0x1], 1 }

</bundles_post_ra>
